<compile_context>
chip_gen: v7x
topology: tpu7x:2x2x1
jax: 0.10.0
libtpu: 0.0.40
codegen_flags: <defaults>
</compile_context>

<pallas_src>
import jax
import jax.numpy as jnp
from jax.experimental import pallas as pl
from jax.experimental.pallas import tpu as pltpu


def _round_up(x: int, m: int) -> int:
    return ((x + m - 1) // m) * m


def _make_mlp_kernel(num_linear: int, apply_relu: bool, matmul_dtype):
    """Fused kernel: h = x; for each layer: h = act(h @ W_i + b_i)."""

    def kernel(x_ref, *refs):
        o_ref = refs[-1]
        wb_refs = refs[:-1]  # w0, b0, w1, b1, ...
        h = x_ref[...].astype(jnp.float32)
        # Static Python loop: unrolled at trace time; intermediates stay in
        # VMEM/vregs, never touching HBM.
        for i in range(num_linear):
            w = wb_refs[2 * i][...]
            b = wb_refs[2 * i + 1][...].astype(jnp.float32)
            # Cast only the dot operands (no-op when matmul_dtype == f32);
            # accumulate / bias / ReLU in f32.
            h = jnp.dot(
                h.astype(matmul_dtype),
                w.astype(matmul_dtype),
                preferred_element_type=jnp.float32,
            ) + b
            if apply_relu and i < num_linear - 1:
                h = jnp.maximum(h, 0.0)
        o_ref[...] = h.astype(o_ref.dtype)

    return kernel


def mlp_forward_pallas(x, weights, biases, *, apply_relu: bool,
                       matmul_dtype=jnp.float32):
    """Fused MLP forward.

    x:        (N, d_in)  unpadded f32 input.
    weights:  list of (din_i, dout_i); layer 0 input dim and last layer output
              dim are the TRUE dims, hidden dims are padded to multiples of 128.
    biases:   list of (1, dout_i) f32.
    Returns (N, hs[-1]) f32 -- no slicing needed by the caller.
    """
    num_linear = len(weights)
    n, d_in = x.shape
    d_last = weights[-1].shape[1]

    # --- batch tiling -----------------------------------------------------
    n8 = _round_up(n, 8)
    if n8 <= 256:
        tm = n8  # single tile; too small to be worth splitting
    else:
        # Aim for >= ~3-8 grid steps so x-in / y-out DMAs pipeline against
        # MXU work and the batch axis can shard across both v7x TensorCores.
        tm = min(512, max(128, _round_up(pl.cdiv(n, 8), 8)))
    grid = (pl.cdiv(n, tm),)  # partial last tile: OOB write is clipped,
                              # OOB rows are independent and never read back.

    # --- specs --------------------------------------------------------------
    in_specs = [pl.BlockSpec((tm, d_in), lambda i: (i, 0))]
    operands = [x]
    for w, b in zip(weights, biases):
        # Full-array blocks: weights/biases stay VMEM-resident across steps.
        in_specs.append(pl.BlockSpec(w.shape, lambda i: (0, 0)))
        in_specs.append(pl.BlockSpec(b.shape, lambda i: (0, 0)))
        operands.append(w)
        operands.append(b)
    out_specs = pl.BlockSpec((tm, d_last), lambda i: (i, 0))

    # --- VMEM budget (counts 2x buffers for every input spec) --------------
    def nbytes(a):
        return int(a.size) * a.dtype.itemsize

    param_bytes = sum(nbytes(w) + nbytes(b) for w, b in zip(weights, biases))
    max_feat = max([d_in, d_last] + [w.shape[1] for w in weights])
    act_bytes = tm * max_feat * 4  # f32 activation slab
    need = (2 * param_bytes
            + 2 * tm * d_in * x.dtype.itemsize
            + 2 * tm * d_last * 4
            + 3 * act_bytes)
    try:
        phys_vmem = int(pltpu.get_tpu_info().vmem_capacity_bytes)
    except Exception:
        phys_vmem = 64 << 20  # conservative fallback (v7x per-TC VMEM)
    vmem_limit = int(min(max(need + (4 << 20), 16 << 20), int(0.75 * phys_vmem)))

    # --- scheduling hint ----------------------------------------------------
    flops = 2 * n * sum(w.shape[0] * w.shape[1] for w in weights)
    bytes_accessed = int(nbytes(x) + n * d_last * 4 + param_bytes)
    cost = pl.CostEstimate(flops=flops, transcendentals=0,
                           bytes_accessed=bytes_accessed)

    kernel = _make_mlp_kernel(num_linear, apply_relu, matmul_dtype)
    return pl.pallas_call(
        kernel,
        out_shape=jax.ShapeDtypeStruct((n, d_last), jnp.float32),
        grid=grid,
        in_specs=in_specs,
        out_specs=out_specs,
        compiler_params=pltpu.CompilerParams(
            dimension_semantics=("parallel",),
            vmem_limit_bytes=vmem_limit,
        ),
        cost_estimate=cost,
    )(*operands)


class MLPPallas:
    """JAX/Pallas equivalent of the PyTorch MLP module.

    Args:
        hs: list of int, [input_dim, hidden..., output_dim].
        act: "relu" or None (applied to all but the last layer, matching the
             PyTorch module).
        matmul_dtype: dtype used for the MXU operands (jnp.float32 matches the
             reference numerics; jnp.bfloat16 for higher MXU throughput with
             f32 accumulation).
    """

    def __init__(self, hs, act="relu", key=None, matmul_dtype=jnp.float32):
        self.hs = list(hs)
        self.act = act
        self.matmul_dtype = matmul_dtype
        if key is None:
            key = jax.random.PRNGKey(0)

        self.weights = []        # unpadded f32 (d_in, d_out)  -- reference
        self.biases = []         # unpadded f32 (1, d_out)     -- reference
        self.padded_weights = [] # padded to the kernel's layout, matmul_dtype
        self.padded_biases = []  # (1, d_out_pad) f32

        num_linear = len(hs) - 1
        for i in range(num_linear):
            key, wk, bk = jax.random.split(key, 3)
            fan_in = hs[i]
            bound = 1.0 / float(fan_in) ** 0.5
            # Deterministic init mimicking nn.Linear's U(-1/sqrt(in), 1/sqrt(in)).
            w = jax.random.uniform(wk, (hs[i], hs[i + 1]), jnp.float32,
                                   -bound, bound)
            b = jax.random.uniform(bk, (1, hs[i + 1]), jnp.float32,
                                   -bound, bound)
            self.weights.append(w)
            self.biases.append(b)

            # Layer 0 keeps the TRUE input dim (x is passed unpadded); the
            # LAST layer keeps the TRUE output dim (lane-true HBM output);
            # hidden dims are padded to 128 for lane-dense intermediates.
            d_in_p = hs[i] if i == 0 else _round_up(hs[i], 128)
            d_out_p = hs[i + 1] if i == num_linear - 1 else _round_up(hs[i + 1], 128)
            w_pad = (jnp.zeros((d_in_p, d_out_p), matmul_dtype)
                     .at[: hs[i], : hs[i + 1]].set(w.astype(matmul_dtype)))
            b_pad = (jnp.zeros((1, d_out_p), jnp.float32)
                     .at[:, : hs[i + 1]].set(b))
            self.padded_weights.append(w_pad)
            self.padded_biases.append(b_pad)

    def __call__(self, x):
        n, d_in = x.shape
        assert d_in == self.hs[0], f"expected input dim {self.hs[0]}, got {d_in}"
        return mlp_forward_pallas(
            x.astype(jnp.float32),
            self.padded_weights,
            self.padded_biases,
            apply_relu=self.act is not None,
            matmul_dtype=self.matmul_dtype,
        )

    def __repr__(self):
        return f"{self.__class__.__name__}(hs={self.hs}, act={self.act})"


def _reference_forward(mlp: MLPPallas, x):
    """Pure-JAX reference (unpadded f32 weights) for correctness checking."""
    num_linear = len(mlp.weights)
    h = x.astype(jnp.float32)
    for i, (w, b) in enumerate(zip(mlp.weights, mlp.biases)):
        h = h @ w + b
        if mlp.act is not None and i < num_linear - 1:
            h = jnp.maximum(h, 0.0)
    return h


if __name__ == "__main__":
    key = jax.random.PRNGKey(0)
    key, xk, xk2 = jax.random.split(key, 3)

    # Small shapes consistent with the module: hs = [16, 32, 32, 8], ReLU.
    hs = [16, 32, 32, 8]
    x_small = jax.random.normal(xk, (8, hs[0]), dtype=jnp.float32)
    x_large = jax.random.normal(xk2, (300, hs[0]), dtype=jnp.float32)

    mlp = MLPPallas(hs, act="relu", key=key)

    # Single-tile path (batch=8 -> tm=8, grid=1).
    out = jax.block_until_ready(mlp(x_small))
    ref = _reference_forward(mlp, x_small)
    assert out.shape == (8, hs[-1])
    assert jnp.allclose(out, ref, atol=1e-5, rtol=1e-5)

    # Multi-step grid with a partial last tile (batch=300 -> tm=128, grid=3).
    out_l = jax.block_until_ready(mlp(x_large))
    ref_l = _reference_forward(mlp, x_large)
    assert out_l.shape == (300, hs[-1])
    assert jnp.allclose(out_l, ref_l, atol=1e-5, rtol=1e-5)

    # act=None path (no activation between layers).
    mlp_noact = MLPPallas([16, 32, 8], act=None, key=jax.random.PRNGKey(1))
    out2 = jax.block_until_ready(mlp_noact(x_small))
    ref2 = _reference_forward(mlp_noact, x_small)
    assert jnp.allclose(out2, ref2, atol=1e-5, rtol=1e-5)

    # bf16-at-the-MXU path (f32 accumulate); numerics intentionally looser.
    mlp_bf16 = MLPPallas(hs, act="relu", key=key, matmul_dtype=jnp.bfloat16)
    out_bf = jax.block_until_ready(mlp_bf16(x_large))
    ref_bf = _reference_forward(mlp_bf16, x_large)
    assert out_bf.shape == (300, hs[-1])
    assert jnp.allclose(out_bf, ref_bf, atol=1e-1, rtol=1e-1)

    print("KERNEL_OK")
</pallas_src>

<mosaic_0001>
module attributes {stable_mosaic.version = 11 : i64} {
  func.func @kernel(%arg0: i32, %arg1: memref<8x16xf32, #tpu.memory_space<vmem>>, %arg2: memref<16x128xf32, #tpu.memory_space<vmem>>, %arg3: memref<1x128xf32, #tpu.memory_space<vmem>>, %arg4: memref<128x128xf32, #tpu.memory_space<vmem>>, %arg5: memref<1x128xf32, #tpu.memory_space<vmem>>, %arg6: memref<128x8xf32, #tpu.memory_space<vmem>>, %arg7: memref<1x8xf32, #tpu.memory_space<vmem>>, %arg8: memref<8x8xf32, #tpu.memory_space<vmem>>) attributes {dimension_semantics = [#tpu.dimension_semantics<parallel>], iteration_bounds = array<i64: 1>, scalar_prefetch = 0 : i64, scratch_operands = 0 : i64, tpu.core_type = #tpu.core_type<tc>, window_params = [{transform_indices = @transform_0, window_bounds = array<i64: 8, 16>}, {pipeline_mode = #tpu.pipeline_mode<synchronous>, transform_indices = @transform_1, window_bounds = array<i64: 16, 128>}, {pipeline_mode = #tpu.pipeline_mode<synchronous>, transform_indices = @transform_2, window_bounds = array<i64: 1, 128>}, {pipeline_mode = #tpu.pipeline_mode<synchronous>, transform_indices = @transform_3, window_bounds = array<i64: 128, 128>}, {pipeline_mode = #tpu.pipeline_mode<synchronous>, transform_indices = @transform_4, window_bounds = array<i64: 1, 128>}, {pipeline_mode = #tpu.pipeline_mode<synchronous>, transform_indices = @transform_5, window_bounds = array<i64: 128, 8>}, {pipeline_mode = #tpu.pipeline_mode<synchronous>, transform_indices = @transform_6, window_bounds = array<i64: 1, 8>}, {transform_indices = @transform_7, window_bounds = array<i64: 8, 8>}]} {
    %c0 = arith.constant 0 : index
    %c0_0 = arith.constant 0 : index
    %0 = vector.load %arg1[%c0, %c0_0] : memref<8x16xf32, #tpu.memory_space<vmem>>, vector<8x16xf32>
    %c0_1 = arith.constant 0 : index
    %c0_2 = arith.constant 0 : index
    %1 = vector.load %arg2[%c0_1, %c0_2] : memref<16x128xf32, #tpu.memory_space<vmem>>, vector<16x128xf32>
    %c0_3 = arith.constant 0 : index
    %c0_4 = arith.constant 0 : index
    %2 = vector.load %arg3[%c0_3, %c0_4] : memref<1x128xf32, #tpu.memory_space<vmem>>, vector<1x128xf32>
    %cst = arith.constant dense<0.000000e+00> : vector<8x128xf32>
    %3 = tpu.matmul %0, %1, %cst {dimension_numbers = #tpu.dot_dimension_numbers<[1], [0], [0], [1], [0, 0, 1, 1], [], []>} : vector<8x16xf32>, vector<16x128xf32>, vector<8x128xf32> -> vector<8x128xf32>
    %4 = vector.broadcast %2 : vector<1x128xf32> to vector<8x128xf32>
    %5 = arith.addf %3, %4 : vector<8x128xf32>
    %cst_5 = arith.constant 0.000000e+00 : f32
    %6 = vector.broadcast %cst_5 : f32 to vector<8x128xf32>
    %7 = arith.maximumf %5, %6 : vector<8x128xf32>
    %c0_6 = arith.constant 0 : index
    %c0_7 = arith.constant 0 : index
    %8 = vector.load %arg4[%c0_6, %c0_7] : memref<128x128xf32, #tpu.memory_space<vmem>>, vector<128x128xf32>
    %c0_8 = arith.constant 0 : index
    %c0_9 = arith.constant 0 : index
    %9 = vector.load %arg5[%c0_8, %c0_9] : memref<1x128xf32, #tpu.memory_space<vmem>>, vector<1x128xf32>
    %cst_10 = arith.constant dense<0.000000e+00> : vector<8x128xf32>
    %10 = tpu.matmul %7, %8, %cst_10 {dimension_numbers = #tpu.dot_dimension_numbers<[1], [0], [0], [1], [0, 0, 1, 1], [], []>} : vector<8x128xf32>, vector<128x128xf32>, vector<8x128xf32> -> vector<8x128xf32>
    %11 = vector.broadcast %9 : vector<1x128xf32> to vector<8x128xf32>
    %12 = arith.addf %10, %11 : vector<8x128xf32>
    %cst_11 = arith.constant 0.000000e+00 : f32
    %13 = vector.broadcast %cst_11 : f32 to vector<8x128xf32>
    %14 = arith.maximumf %12, %13 : vector<8x128xf32>
    %c0_12 = arith.constant 0 : index
    %c0_13 = arith.constant 0 : index
    %15 = vector.load %arg6[%c0_12, %c0_13] : memref<128x8xf32, #tpu.memory_space<vmem>>, vector<128x8xf32>
    %c0_14 = arith.constant 0 : index
    %c0_15 = arith.constant 0 : index
    %16 = vector.load %arg7[%c0_14, %c0_15] : memref<1x8xf32, #tpu.memory_space<vmem>>, vector<1x8xf32>
    %cst_16 = arith.constant dense<0.000000e+00> : vector<8x8xf32>
    %17 = tpu.matmul %14, %15, %cst_16 {dimension_numbers = #tpu.dot_dimension_numbers<[1], [0], [0], [1], [0, 0, 1, 1], [], []>} : vector<8x128xf32>, vector<128x8xf32>, vector<8x8xf32> -> vector<8x8xf32>
    %18 = vector.broadcast %16 : vector<1x8xf32> to vector<8x8xf32>
    %19 = arith.addf %17, %18 : vector<8x8xf32>
    %c0_17 = arith.constant 0 : index
    %c0_18 = arith.constant 0 : index
    %20 = vector.load %arg8[%c0_17, %c0_18] : memref<8x8xf32, #tpu.memory_space<vmem>>, vector<8x8xf32>
    tpu.vector_store %arg8[%c0_17, %c0_18], %19 {strides = array<i32>} : memref<8x8xf32, #tpu.memory_space<vmem>>, vector<8x8xf32>,
    return
  }
  func.func @transform_0(%arg0: i32) -> (i32, i32) {
    %c0_i32 = arith.constant 0 : i32
    %c0_i32_0 = arith.constant 0 : i32
    return %arg0, %c0_i32 : i32, i32
  }
  func.func @transform_1(%arg0: i32) -> (i32, i32) {
    %c0_i32 = arith.constant 0 : i32
    %c0_i32_0 = arith.constant 0 : i32
    %c0_i32_1 = arith.constant 0 : i32
    return %c0_i32, %c0_i32_0 : i32, i32
  }
  func.func @transform_2(%arg0: i32) -> (i32, i32) {
    %c0_i32 = arith.constant 0 : i32
    %c0_i32_0 = arith.constant 0 : i32
    %c0_i32_1 = arith.constant 0 : i32
    return %c0_i32, %c0_i32_0 : i32, i32
  }
  func.func @transform_3(%arg0: i32) -> (i32, i32) {
    %c0_i32 = arith.constant 0 : i32
    %c0_i32_0 = arith.constant 0 : i32
    %c0_i32_1 = arith.constant 0 : i32
    return %c0_i32, %c0_i32_0 : i32, i32
  }
  func.func @transform_4(%arg0: i32) -> (i32, i32) {
    %c0_i32 = arith.constant 0 : i32
    %c0_i32_0 = arith.constant 0 : i32
    %c0_i32_1 = arith.constant 0 : i32
    return %c0_i32, %c0_i32_0 : i32, i32
  }
  func.func @transform_5(%arg0: i32) -> (i32, i32) {
    %c0_i32 = arith.constant 0 : i32
    %c0_i32_0 = arith.constant 0 : i32
    %c0_i32_1 = arith.constant 0 : i32
    return %c0_i32, %c0_i32_0 : i32, i32
  }
  func.func @transform_6(%arg0: i32) -> (i32, i32) {
    %c0_i32 = arith.constant 0 : i32
    %c0_i32_0 = arith.constant 0 : i32
    %c0_i32_1 = arith.constant 0 : i32
    return %c0_i32, %c0_i32_0 : i32, i32
  }
  func.func @transform_7(%arg0: i32) -> (i32, i32) {
    %c0_i32 = arith.constant 0 : i32
    %c0_i32_0 = arith.constant 0 : i32
    return %arg0, %c0_i32 : i32, i32
  }
}

</mosaic_0001>

<bundles_post_ra>
// kernel: tpu_custom_call.1
= control target key start
LH: loop header
LB: loop body
LE: loop exit
PB: predicated region body
PF: predicated region fallthrough
CT: control target
= control target key end

     0   :  { %12 = vsyncpa [#allocation3], 0  ;;  %s750_s0 = inlined_call_operand.hbm [shape: f32[8,16], index: 0, kind: input, shape index: {}]   ;;  %s751_s1 = inlined_call_operand.vmem [shape: f32[16,128], index: 1, kind: input, shape index: {}]   ;;  %s752_s2 = inlined_call_operand.vmem [shape: f32[1,128], index: 2, kind: input, shape index: {}]   ;;  %s753_s3 = inlined_call_operand.vmem [shape: f32[128,128], index: 3, kind: input, shape index: {}]   ;;  %s754_s4 = inlined_call_operand.vmem [shape: f32[1,128], index: 4, kind: input, shape index: {}]   ;;  %s755_s5 = inlined_call_operand.vmem [shape: f32[128,8], index: 5, kind: input, shape index: {}]   ;;  %s756_s6 = inlined_call_operand.vmem [shape: f32[1,8], index: 6, kind: input, shape index: {}]   ;;  %s757_s7 = inlined_call_operand.hbm [shape: f32[8,8], index: 7, kind: output, shape index: {}]  }
   0x1   :  { %13 = vsyncpa [#allocation4], 0  ;;  %s550_s24 = smov [#allocation2]   ;;  %s502_s28 = scalar_lea.hbm %s750_s0, 128 }
   0x2   :  { %s20_s25 = sshll.u32 %s550_s24, 4  ;;  %p503_p0 = scmp.ne.s32.totalorder %s750_s0, %s502_s28  ;;  %s21_s25 = int_to_ptr.vmem [resolvable:$true] %s20_s25 }
   0x3   :  { %p506_p1 = scmp.lt.u32.totalorder %s502_s28, %s750_s0 }
   0x5   :  { %p508_p2 = pnand %p506_p1, %p503_p0 }
   0x7   :  { %511 = shalt.err (!%p508_p2)
}
   0x8   :  { %s512_s10 = scalar_lea.vmem %s21_s25, 128  ;;  %p517_p4 = scmp.lt.s32.totalorder %s21_s25, %s21_s25 }
   0x9   :  { %p513_p3 = scmp.ne.s32.totalorder %s21_s25, %s512_s10  ;;  %p518_p5 = scmp.lt.s32.totalorder %s512_s10, %s512_s10 }
   0xb   :  { %p519_p6 = por %p518_p5, %p517_p4 }
   0xd   :  { %p520_p7 = pnand %p519_p6, %p513_p3 }
   0xf   :  { %523 = shalt.err (!%p520_p7)
}
  0x10   :  { %23 = dma.hbm_to_vmem [thread:$0]  %s750_s0, 128, %s21_s25, [#allocation3]  }
  0x11   :  { %546 = dma.done.wait [#allocation3], 128  }
  0x12   :  { %547 = vsyncadd [#allocation3], 4294967168  ;;  %v551_v0 = vmov 0.0|0.0   ;;  %vm552_vm0 = vmmov 0   ;;  %v553_v1 = vmov 0.0   ;;  %v40_v2 = vld [vmem:[%s751_s1] sm:$0xff] }
  0x13   :  { %446 = vmatprep.subr.bf16.mxu0 %v551_v0  ;;  %373 = vmatprep.mubr.msk.f32.mxu0 %vm552_vm0, %v553_v1  ;;  %v41_v3 = vld [vmem:[%s751_s1 + $0x8] sm:$0xff]  ;;  %v124_v5 = vld [vmem:[%s753_s3] sm:$0xff]  ;;  %v126_v7 = vld [vmem:[%s753_s3 + $0x10] sm:$0xff]  ;;  %vm49_vm1 = vcmask 130048   ;;  %s554_s9 = smov [#allocation5]   ;;  %vm311_vm2 = vcmask 64512  }
  0x14   :  { %449 = vmatprep.subr.bf16.mxu1 %v551_v0  ;;  %408 = vmatprep.mubr.msk.f32.mxu1 %vm552_vm0, %v553_v1  ;;  %v447_v4 = vpack.c.bf16 %v41_v3, %v40_v2  ;;  %v125_v6 = vld [vmem:[%s753_s3 + $0x8] sm:$0xff]  ;;  %v127_v9 = vld [vmem:[%s753_s3 + $0x18] sm:$0xff]  ;;  %v39_v10 = vld [vmem:[#allocation2] sm:$0xff]  ;;  %s319_s10 = sshll.u32 %s554_s9, 4  ;;  %s320_s10 = int_to_ptr.vmem [resolvable:$true] %s319_s10 }
  0x15   :  { %v450_v8 = vpack.c.bf16 %v125_v6, %v124_v5  ;;  %v453_v11 = vpack.c.bf16 %v127_v9, %v126_v7  ;;  %v128_v12 = vld [vmem:[%s753_s3 + $0x20] sm:$0xff]  ;;  %v129_v13 = vld [vmem:[%s753_s3 + $0x28] sm:$0xff]  ;;  %v130_v15 = vld [vmem:[%s753_s3 + $0x30] sm:$0xff]  ;;  %p529_p9 = scmp.lt.s32.totalorder %s320_s10, %s320_s10 }
  0x16   :  { %448 = vmatpush3.bf16.msra.mxu0 %v447_v4  ;;  %v456_v14 = vpack.c.bf16 %v129_v13, %v128_v12  ;;  %v131_v16 = vld [vmem:[%s753_s3 + $0x38] sm:$0xff]  ;;  %v132_v18 = vld [vmem:[%s753_s3 + $0x40] sm:$0xff]  ;;  %v133_v19 = vld [vmem:[%s753_s3 + $0x48] sm:$0xff] }
  0x17   :  { %451 = vmatpush3.bf16.msra.mxu1 %v450_v8  ;;  %473 = vmatprep.subr.bf16.mxu0 %v551_v0  ;;  %v459_v17 = vpack.c.bf16 %v131_v16, %v130_v15  ;;  %v462_v20 = vpack.c.bf16 %v133_v19, %v132_v18  ;;  %v134_v21 = vld [vmem:[%s753_s3 + $0x50] sm:$0xff]  ;;  %v135_v22 = vld [vmem:[%s753_s3 + $0x58] sm:$0xff]  ;;  %v136_v24 = vld [vmem:[%s753_s3 + $0x60] sm:$0xff] }
  0x18   :  { %452 = vmatprep.subr.bf16.mxu1 %v551_v0  ;;  %v465_v23 = vpack.c.bf16 %v135_v22, %v134_v21  ;;  %v137_v25 = vld [vmem:[%s753_s3 + $0x68] sm:$0xff]  ;;  %v138_v27 = vld [vmem:[%s753_s3 + $0x70] sm:$0xff]  ;;  %v139_v28 = vld [vmem:[%s753_s3 + $0x78] sm:$0xff] }
  0x19   :  { %374 = vmatmul.mubr.msk.f32.vlgmr.msra.gmra.mrb[0].mxu0 %vm49_vm1, %v39_v10  ;;  %v468_v26 = vpack.c.bf16 %v137_v25, %v136_v24  ;;  %v471_v29 = vpack.c.bf16 %v139_v28, %v138_v27  ;;  %v218_v30 = vld [vmem:[%s755_s5] sm:$0xff]  ;;  %v219_v31 = vld [vmem:[%s755_s5 + $0x8] sm:$0xff]  ;;  %v220_v32 = vld [vmem:[%s755_s5 + $0x10] sm:$0xff] }
  0x1a   :  { %443 = vmatprep.mubr.msk.f32.mxu0 %vm552_vm0, %v553_v1  ;;  %v474_v33 = vpack.c.bf16 %v219_v31, %v218_v30  ;;  %v221_v34 = vld [vmem:[%s755_s5 + $0x18] sm:$0xff]  ;;  %v222_v36 = vld [vmem:[%s755_s5 + $0x20] sm:$0xff]  ;;  %v223_v37 = vld [vmem:[%s755_s5 + $0x28] sm:$0xff] }
  0x1b   :  { %454 = vmatpush3.bf16.msra.mxu1 %v453_v11  ;;  %v477_v35 = vpack.c.bf16 %v221_v34, %v220_v32  ;;  %v480_v38 = vpack.c.bf16 %v223_v37, %v222_v36  ;;  %v224_v39 = vld [vmem:[%s755_s5 + $0x30] sm:$0xff]  ;;  %v225_v40 = vld [vmem:[%s755_s5 + $0x38] sm:$0xff]  ;;  %v226_v42 = vld [vmem:[%s755_s5 + $0x40] sm:$0xff] }
  0x1c   :  { %455 = vmatprep.subr.bf16.mxu1 %v551_v0  ;;  %475 = vmatpush3.bf16.msra.mxu0 %v474_v33  ;;  %v483_v41 = vpack.c.bf16 %v225_v40, %v224_v39  ;;  %v227_v43 = vld [vmem:[%s755_s5 + $0x48] sm:$0xff]  ;;  %v228_v45 = vld [vmem:[%s755_s5 + $0x50] sm:$0xff]  ;;  %v229_v46 = vld [vmem:[%s755_s5 + $0x58] sm:$0xff] }
  0x1d   :  { %476 = vmatprep.subr.bf16.mxu0 %v551_v0  ;;  %v486_v44 = vpack.c.bf16 %v227_v43, %v226_v42  ;;  %v489_v47 = vpack.c.bf16 %v229_v46, %v228_v45  ;;  %v230_v48 = vld [vmem:[%s755_s5 + $0x60] sm:$0xff]  ;;  %v231_v49 = vld [vmem:[%s755_s5 + $0x68] sm:$0xff]  ;;  %v232_v56 = vld [vmem:[%s755_s5 + $0x70] sm:$0xff] }
  0x1e   :  { %v492_v50 = vpack.c.bf16 %v231_v49, %v230_v48  ;;  %v328_v51 = vld [vmem:[%s752_s2] ss:$0 sm:$0xff]  ;;  %v233_v57 = vld [vmem:[%s755_s5 + $0x78] sm:$0xff]  ;;  %s524_s5 = scalar_lea.vmem %s320_s10, 128 }
  0x1f   :  { %457 = vmatpush3.bf16.msra.mxu1 %v456_v14  ;;  %v495_v58 = vpack.c.bf16 %v233_v57, %v232_v56  ;;  %v330_v59 = vld [vmem:[%s754_s4] ss:$0 sm:$0xff]  ;;  %p525_p8 = scmp.ne.s32.totalorder %s320_s10, %s524_s5  ;;  %p530_p10 = scmp.lt.s32.totalorder %s524_s5, %s524_s5 }
  0x20   :  { %458 = vmatprep.subr.bf16.mxu1 %v551_v0  ;;  %478 = vmatpush3.bf16.msra.mxu0 %v477_v35 }
  0x21   :  { %479 = vmatprep.subr.bf16.mxu0 %v551_v0  ;;  %p531_p11 = por %p530_p10, %p529_p9 }
  0x23   :  { %460 = vmatpush3.bf16.msra.mxu1 %v459_v17  ;;  %p532_p12 = pnand %p531_p11, %p525_p8 }
  0x24   :  { %461 = vmatprep.subr.bf16.mxu1 %v551_v0  ;;  %481 = vmatpush3.bf16.msra.mxu0 %v480_v38 }
  0x25   :  { %482 = vmatprep.subr.bf16.mxu0 %v551_v0 }
  0x27   :  { %463 = vmatpush3.bf16.msra.mxu1 %v462_v20 }
  0x28   :  { %464 = vmatprep.subr.bf16.mxu1 %v551_v0  ;;  %484 = vmatpush3.bf16.msra.mxu0 %v483_v41 }
  0x29   :  { %485 = vmatprep.subr.bf16.mxu0 %v551_v0 }
  0x2b   :  { %466 = vmatpush3.bf16.msra.mxu1 %v465_v23 }
  0x2c   :  { %467 = vmatprep.subr.bf16.mxu1 %v551_v0  ;;  %487 = vmatpush3.bf16.msra.mxu0 %v486_v44 }
  0x2d   :  { %488 = vmatprep.subr.bf16.mxu0 %v551_v0 }
  0x2f   :  { %469 = vmatpush3.bf16.msra.mxu1 %v468_v26 }
  0x30   :  { %470 = vmatprep.subr.bf16.mxu1 %v551_v0  ;;  %490 = vmatpush3.bf16.msra.mxu0 %v489_v47 }
  0x31   :  { %491 = vmatprep.subr.bf16.mxu0 %v551_v0 }
  0x33   :  { %472 = vmatpush3.bf16.msra.mxu1 %v471_v29 }
  0x34   :  { %493 = vmatpush3.bf16.msra.mxu0 %v492_v50 }
  0x35   :  { %494 = vmatprep.subr.bf16.mxu0 %v551_v0  ;;  %v331_v0 = vld [vmem:[%s756_s6] ss:$0 sm:$0xff] }
  0x38   :  { %496 = vmatpush3.bf16.msra.mxu0 %v495_v58 }
  0xec   :  { %v119_v52 = vpop.f32.mrb[0].mxu0 }
  0xed   :  { %v120_v53 = vadd.f32 %v328_v51, %v119_v52  ;;  %v375_v54 = vpop.f32.mrb[1].mxu0 }
  0xef   :  { %v123_v55 = vmax.f32 %v120_v53, 0.0 }
  0xf1   :  { %409 = vmatmul.mubr.f32.vlgmr.msra.gmra.mrb[0].mxu1 %v123_v55 }
 0x1c4   :  { %v213_v60 = vpop.f32.mrb[0].mxu1 }
 0x1c5   :  { %v214_v61 = vadd.f32 %v330_v59, %v213_v60  ;;  %v410_v62 = vpop.f32.mrb[1].mxu1 }
 0x1c7   :  { %v217_v63 = vmax.f32 %v214_v61, 0.0 }
 0x1c9   :  { %444 = vmatmul.mubr.f32.vlgmr.msra.gmra.mrb[2].mxu0 %v217_v63 }
 0x29c   :  { %v307_v1 = vpop.f32.mrb[2].mxu0 }
 0x29d   :  { %v308_v2 = vadd.f32 %v331_v0, %v307_v1  ;;  %v445_v3 = vpop.f32.mrb[3].mxu0 }
 0x29f   :  { %312 = vst.msk [vmem:[#allocation5] sm:$0xff] %vm311_vm2, %v308_v2 }
 0x2a0   :  { %535 = shalt.err (!%p532_p12)
}
 0x2a1   :  { %s536_s12 = scalar_lea.hbm %s757_s7, 128 }
 0x2a2   :  { %p537_p13 = scmp.ne.s32.totalorder %s757_s7, %s536_s12  ;;  %p540_p0 = scmp.lt.u32.totalorder %s536_s12, %s757_s7 }
 0x2a4   :  { %p542_p1 = pnand %p540_p0, %p537_p13 }
 0x2a6   :  { %545 = shalt.err (!%p542_p1)
}
 0x2a7   :  { %322 = dma.vmem_to_hbm [thread:$0]  %s320_s10, 128, %s757_s7, [#allocation4]  }
 0x2a8   :  { %548 = dma.done.wait [#allocation4], 128  }
 0x2a9   :  { %549 = vsyncadd [#allocation4], 4294967168 }
 0x2aa   :  { %326 = vsyncpa [#allocation3], 1 }
 0x2ab   :  { %327 = vsyncpa [#allocation4], 1 }

</bundles_post_ra>
